<compile_context>
chip_gen: v7x
topology: tpu7x:2x2x1
jax: 0.10.0
libtpu: 0.0.40
codegen_flags: <defaults>
</compile_context>

<pallas_src>
import jax
import jax.numpy as jnp
import numpy as np
from jax.experimental import pallas as pl
from jax.experimental.pallas import tpu as pltpu

B, C, H, W = 2, 4, 16, 16
D = C * H * W                   # 1024 flattened input features
F = 32                          # backbone.num_features (per head)
NC = 8                          # classifier head width
NUM_ENSEMBLE = 5
DROP_RATE = 0.05
NUM_HEADS = 2
F2 = NUM_HEADS * F              # 64: both heads' features side by side
LHS_W = 3 * F2                  # 192: [feat | feat*m1 | feat*m2]
OUT_LANES = 128                 # per-head packed slab: feat|logits|logits_v|pad
OUT_W = NUM_HEADS * OUT_LANES   # 256


def _ucvme_fused_kernel(x_ref, wb_ref, bb_ref, mask_ref, wh_ref, bh_ref, out_ref):
    """Single-step fused forward for both backbone heads."""
    # Backbone (both heads, one MXU push): relu(x @ [Wb_1|Wb_2] + [bb_1|bb_2]).
    feat = jnp.dot(x_ref[...], wb_ref[...], preferred_element_type=jnp.float32)
    feat = jnp.maximum(feat + bb_ref[...], 0.0)                    # [B, 2F] f32

    # 5-draw MC-dropout ensemble folded into the mean scaled masks.  Feature
    # passthrough + classifier + fc_v for BOTH heads come out of ONE MXU push
    # against the precomputed block-diagonal RHS, already in the packed
    # lane-dense layout: cols[h*128+0:32]=feat_h, [32:40]=logits_h, [40]=lv_h.
    lhs = jnp.concatenate(
        [feat, feat * mask_ref[0], feat * mask_ref[1]], axis=1)    # [B, 6F] f32
    out = jnp.dot(lhs.astype(jnp.bfloat16), wh_ref[...],
                  preferred_element_type=jnp.float32)              # [B, 256] f32
    out_ref[...] = out + bh_ref[...]                               # unmasked vst


_VMEM = pl.BlockSpec(memory_space=pltpu.MemorySpace.VMEM)


@jax.jit
def ucvme_forward(x, wb_cat, bb_cat, mask, wh, bh):
    """Hot-path forward: reshape, one pallas_call, slice the packed slab."""
    x_flat = x.reshape(x.shape[0], -1).astype(jnp.bfloat16)        # [B, D] bf16
    packed = pl.pallas_call(
        _ucvme_fused_kernel,
        out_shape=jax.ShapeDtypeStruct((x.shape[0], OUT_W), jnp.float32),
        in_specs=[_VMEM] * 6,
        out_specs=_VMEM,
    )(x_flat, wb_cat, bb_cat, mask, wh, bh)

    o1, o2 = packed[:, :OUT_LANES], packed[:, OUT_LANES:]
    feat_1, logits_1, lv_1 = o1[:, :F], o1[:, F:F + NC], o1[:, F + NC]
    feat_2, logits_2, lv_2 = o2[:, :F], o2[:, F:F + NC], o2[:, F + NC]
    return {
        "logits": (logits_1 + logits_2) / 2,
        "logits_v": (lv_1 + lv_2) / 2,
        "logits_1": logits_1,
        "logits_2": logits_2,
        "logits_v_1": lv_1,
        "logits_v_2": lv_2,
        "feat": (feat_1 + feat_2) / 2,
        "feat_1": feat_1,
        "feat_2": feat_2,
    }


def make_mean_masks(seed, num_ensemble=NUM_ENSEMBLE, drop_rate=DROP_RATE):
    """Mean of `num_ensemble` inverted-dropout masks per head per dropout call.

    Returns (m1, m2), each [NUM_HEADS, B, F], already scaled by 1/keep_prob.
    m1 feeds the classifier (logits) path, m2 the fc_v (logits_v) path.
    """
    keep = 1.0 - drop_rate
    keys = jax.random.split(jax.random.PRNGKey(seed), 2 * NUM_HEADS)

    def mean_mask(k):
        draws = jax.random.bernoulli(k, keep, (num_ensemble, B, F))
        return jnp.mean(draws.astype(jnp.float32), axis=0) * (1.0 / keep)

    m1 = jnp.stack([mean_mask(keys[0]), mean_mask(keys[2])], axis=0)
    m2 = jnp.stack([mean_mask(keys[1]), mean_mask(keys[3])], axis=0)
    return m1, m2


def pack_params(params_1, params_2, m1, m2):
    """One-time packing of both heads' weights + mean masks (hoisted off the
    per-call path per the perf review)."""
    wb1, bb1, wc1, bc1, wv1, bv1 = params_1
    wb2, bb2, wc2, bc2, wv2, bv2 = params_2

    # Backbone weights of both heads concatenated along N.
    wb_cat = jnp.concatenate([wb1, wb2], axis=1).astype(jnp.bfloat16)  # [D, 2F]
    bb_cat = jnp.concatenate([bb1, bb2], axis=1)                       # [1, 2F]

    # Block-diagonal head RHS [3*2F, 256]:
    #   rows   0: 64 (feat)        -> identity into the per-head feat slabs
    #   rows  64:128 (feat*m1)     -> Wc_h into the per-head logits slabs
    #   rows 128:192 (feat*m2)     -> wv_h^T into the per-head logits_v column
    wh = jnp.zeros((LHS_W, OUT_W), jnp.float32)
    eye = jnp.eye(F, dtype=jnp.float32)
    for h, (wc, wv) in enumerate(((wc1, wv1), (wc2, wv2))):
        col0 = h * OUT_LANES
        wh = wh.at[h * F:(h + 1) * F, col0:col0 + F].set(eye)
        wh = wh.at[F2 + h * F:F2 + (h + 1) * F,
                   col0 + F:col0 + F + NC].set(wc)
        wh = wh.at[2 * F2 + h * F:2 * F2 + (h + 1) * F,
                   col0 + F + NC:col0 + F + NC + 1].set(wv.T)
    wh = wh.astype(jnp.bfloat16)

    bh = jnp.zeros((1, OUT_W), jnp.float32)
    for h, (bc, bv) in enumerate(((bc1, bv1), (bc2, bv2))):
        col0 = h * OUT_LANES
        bh = bh.at[:, col0 + F:col0 + F + NC].set(bc)
        bh = bh.at[:, col0 + F + NC].set(bv[0, 0])

    # Mean dropout masks, stacked per path, both heads side-by-side along F.
    mask = jnp.stack([jnp.concatenate([m1[0], m1[1]], axis=1),
                      jnp.concatenate([m2[0], m2[1]], axis=1)], axis=0)  # [2,B,2F]
    return wb_cat, bb_cat, mask, wh, bh


def reference_forward(x, params_1, params_2, m1, m2):
    """Pure-JAX reference using the same mean dropout masks."""
    x_bf = x.reshape(x.shape[0], -1).astype(jnp.bfloat16)
    outs = []
    for h, p in enumerate((params_1, params_2)):
        wb, bb, wc, bc, wv, bv = p
        feat = jnp.maximum(
            jnp.dot(x_bf, wb.astype(jnp.bfloat16),
                    preferred_element_type=jnp.float32) + bb, 0.0)
        logits = jnp.dot(feat * m1[h], wc) + bc
        lv = jnp.sum(feat * m2[h] * wv, axis=-1) + bv[0, 0]
        outs.append({"feat": feat, "logits": logits, "logits_v": lv})
    return outs


def init_backbone_params(key):
    k = jax.random.split(key, 3)
    wb = jax.random.normal(k[0], (D, F), jnp.float32) * (1.0 / np.sqrt(D))
    bb = jnp.zeros((1, F), jnp.float32)
    wc = jax.random.normal(k[1], (F, NC), jnp.float32) * (1.0 / np.sqrt(F))
    bc = jnp.zeros((1, NC), jnp.float32)
    wv = jax.random.normal(k[2], (1, F), jnp.float32) * (1.0 / np.sqrt(F))
    bv = jnp.zeros((1, 1), jnp.float32)
    return (wb, bb, wc, bc, wv, bv)


if __name__ == "__main__":
    root = jax.random.PRNGKey(0)
    kx, k1, k2 = jax.random.split(root, 3)
    x = jax.random.normal(kx, (B, C, H, W), jnp.float32)   # NCHW like PyTorch
    params_1 = init_backbone_params(k1)
    params_2 = init_backbone_params(k2)

    seed = 1234
    m1, m2 = make_mean_masks(seed)                         # one-time, hoisted
    packed_params = jax.tree_util.tree_map(
        jax.block_until_ready, pack_params(params_1, params_2, m1, m2))
    wb_cat, bb_cat, mask, wh, bh = packed_params

    outs = ucvme_forward(x, wb_cat, bb_cat, mask, wh, bh)
    outs = jax.tree_util.tree_map(jax.block_until_ready, outs)

    # pure-JAX reference with the same mean dropout masks
    ref = reference_forward(x, params_1, params_2, m1, m2)

    assert outs["logits"].shape == (B, NC)
    assert outs["logits_v"].shape == (B,)
    assert outs["feat"].shape == (B, F)

    for h, r in enumerate(ref, start=1):
        np.testing.assert_allclose(np.asarray(outs[f"feat_{h}"]),
                                   np.asarray(r["feat"]), rtol=2e-2, atol=2e-2)
        np.testing.assert_allclose(np.asarray(outs[f"logits_{h}"]),
                                   np.asarray(r["logits"]), rtol=2e-2, atol=2e-2)
        np.testing.assert_allclose(np.asarray(outs[f"logits_v_{h}"]),
                                   np.asarray(r["logits_v"]), rtol=2e-2, atol=2e-2)

    assert all(bool(jnp.all(jnp.isfinite(v))) for v in
               (outs["logits"], outs["logits_v"], outs["feat"]))
    print("KERNEL_OK")
</pallas_src>

<mosaic_0001>
module attributes {stable_mosaic.version = 11 : i64} {
  func.func @_ucvme_fused_kernel(%arg0: memref<2x1024xbf16, #tpu.memory_space<vmem>>, %arg1: memref<1024x64xbf16, #tpu.memory_space<vmem>>, %arg2: memref<1x64xf32, #tpu.memory_space<vmem>>, %arg3: memref<2x2x64xf32, #tpu.memory_space<vmem>>, %arg4: memref<192x256xbf16, #tpu.memory_space<vmem>>, %arg5: memref<1x256xf32, #tpu.memory_space<vmem>>, %arg6: memref<2x256xf32, #tpu.memory_space<vmem>>) attributes {dimension_semantics = [], scalar_prefetch = 0 : i64, scratch_operands = 0 : i64, tpu.core_type = #tpu.core_type<tc>} {
    %c0 = arith.constant 0 : index
    %c0_0 = arith.constant 0 : index
    %0 = vector.load %arg0[%c0, %c0_0] : memref<2x1024xbf16, #tpu.memory_space<vmem>>, vector<2x1024xbf16>
    %c0_1 = arith.constant 0 : index
    %c0_2 = arith.constant 0 : index
    %1 = vector.load %arg1[%c0_1, %c0_2] : memref<1024x64xbf16, #tpu.memory_space<vmem>>, vector<1024x64xbf16>
    %cst = arith.constant dense<0.000000e+00> : vector<2x64xf32>
    %2 = tpu.matmul %0, %1, %cst {dimension_numbers = #tpu.dot_dimension_numbers<[1], [0], [0], [1], [0, 0, 1, 1], [], []>} : vector<2x1024xbf16>, vector<1024x64xbf16>, vector<2x64xf32> -> vector<2x64xf32>
    %c0_3 = arith.constant 0 : index
    %c0_4 = arith.constant 0 : index
    %3 = vector.load %arg2[%c0_3, %c0_4] : memref<1x64xf32, #tpu.memory_space<vmem>>, vector<1x64xf32>
    %4 = vector.broadcast %3 : vector<1x64xf32> to vector<2x64xf32>
    %5 = arith.addf %2, %4 : vector<2x64xf32>
    %cst_5 = arith.constant 0.000000e+00 : f32
    %6 = vector.broadcast %cst_5 : f32 to vector<2x64xf32>
    %7 = arith.maximumf %5, %6 : vector<2x64xf32>
    %c0_6 = arith.constant 0 : index
    %c0_7 = arith.constant 0 : index
    %c0_8 = arith.constant 0 : index
    %8 = vector.load %arg3[%c0_6, %c0_7, %c0_8] : memref<2x2x64xf32, #tpu.memory_space<vmem>>, vector<1x2x64xf32>
    %9 = vector.shape_cast %8 : vector<1x2x64xf32> to vector<2x64xf32>
    %10 = arith.mulf %7, %9 : vector<2x64xf32>
    %c1 = arith.constant 1 : index
    %c0_9 = arith.constant 0 : index
    %c0_10 = arith.constant 0 : index
    %11 = vector.load %arg3[%c1, %c0_9, %c0_10] : memref<2x2x64xf32, #tpu.memory_space<vmem>>, vector<1x2x64xf32>
    %12 = vector.shape_cast %11 : vector<1x2x64xf32> to vector<2x64xf32>
    %13 = arith.mulf %7, %12 : vector<2x64xf32>
    %14 = tpu.concatenate %7, %10, %13 in 1 : vector<2x64xf32>, vector<2x64xf32>, vector<2x64xf32> -> vector<2x192xf32>
    %15 = arith.truncf %14 : vector<2x192xf32> to vector<2x192xbf16>
    %c0_11 = arith.constant 0 : index
    %c0_12 = arith.constant 0 : index
    %16 = vector.load %arg4[%c0_11, %c0_12] : memref<192x256xbf16, #tpu.memory_space<vmem>>, vector<192x256xbf16>
    %cst_13 = arith.constant dense<0.000000e+00> : vector<2x256xf32>
    %17 = tpu.matmul %15, %16, %cst_13 {dimension_numbers = #tpu.dot_dimension_numbers<[1], [0], [0], [1], [0, 0, 1, 1], [], []>} : vector<2x192xbf16>, vector<192x256xbf16>, vector<2x256xf32> -> vector<2x256xf32>
    %c0_14 = arith.constant 0 : index
    %c0_15 = arith.constant 0 : index
    %18 = vector.load %arg5[%c0_14, %c0_15] : memref<1x256xf32, #tpu.memory_space<vmem>>, vector<1x256xf32>
    %19 = vector.broadcast %18 : vector<1x256xf32> to vector<2x256xf32>
    %20 = arith.addf %17, %19 : vector<2x256xf32>
    %c0_16 = arith.constant 0 : index
    %c0_17 = arith.constant 0 : index
    %21 = vector.load %arg6[%c0_16, %c0_17] : memref<2x256xf32, #tpu.memory_space<vmem>>, vector<2x256xf32>
    tpu.vector_store %arg6[%c0_16, %c0_17], %20 {strides = array<i32>} : memref<2x256xf32, #tpu.memory_space<vmem>>, vector<2x256xf32>,
    return
  }
}

</mosaic_0001>

<bundles_post_ra>
// kernel: ucvme_forward.1
= control target key start
LH: loop header
LB: loop body
LE: loop exit
PB: predicated region body
PF: predicated region fallthrough
CT: control target
= control target key end

     0   :  { %v1275_v5 = vmov 1966171168   ;;  %v165_v7 = vlaneseq  ;;  %vm772_vm0 = vcmask 523264   ;;  %s1622_s1 = inlined_call_operand.vmem [shape: bf16[1024,64], index: 1, kind: input, shape index: {}]   ;;  %s1623_s0 = inlined_call_operand.vmem [shape: bf16[2,1024], index: 0, kind: input, shape index: {}]   ;;  %s1624_s4 = inlined_call_operand.vmem [shape: bf16[192,256], index: 4, kind: input, shape index: {}]   ;;  %s1625_s2 = inlined_call_operand.vmem [shape: f32[1,64], index: 2, kind: input, shape index: {}]   ;;  %s1626_s3 = inlined_call_operand.vmem [shape: f32[2,2,64], index: 3, kind: input, shape index: {}]   ;;  %s1627_s5 = inlined_call_operand.vmem [shape: f32[1,256], index: 5, kind: input, shape index: {}]   ;;  %s1628_s6 = inlined_call_operand.vmem [shape: f32[2,256], index: 6, kind: output, shape index: {}]  }
   0x1   :  { %v1174_v0 = vld [vmem:[%s1622_s1 + $0x40] sm:$0xff]   ;;  %v1176_v2 = vld [vmem:[%s1622_s1 + $0x48] sm:$0xff]   ;;  %v1178_v4 = vld [vmem:[%s1622_s1 + $0x50] sm:$0xff]   ;;  %v163_v6 = vunpack.c.l.s4 %v1275_v5 }
   0x2   :  { %v1175_v1 = vld [vmem:[%s1622_s1] sm:$0xff]   ;;  %1084 = vmatprep.subr.bf16.mxu1 %v1174_v0  ;;  %v1177_v3 = vld [vmem:[%s1622_s1 + $0x8] sm:$0xff]   ;;  %v1179_v8 = vld [vmem:[%s1622_s1 + $0x10] sm:$0xff]   ;;  %v1333_v11 = vshrl.u32 %v165_v7, 7 }
   0x3   :  { %1085 = vmatpush3.bf16.msra.mxu1 %v1175_v1  ;;  %v1180_v9 = vld [vmem:[%s1622_s1 + $0x58] sm:$0xff]   ;;  %v164_v10 = vunpack.c.0.s8 %v163_v6  ;;  %v1182_v13 = vld [vmem:[%s1622_s1 + $0x60] sm:$0xff]   ;;  %v1184_v16 = vld [vmem:[%s1622_s1 + $0x68] sm:$0xff]  }
   0x4   :  { %1086 = vmatprep.subr.bf16.mxu1 %v1176_v2  ;;  %v1181_v12 = vld [vmem:[%s1622_s1 + $0x18] sm:$0xff]   ;;  %v1183_v15 = vld [vmem:[%s1622_s1 + $0x20] sm:$0xff]   ;;  %v1185_v18 = vld [vmem:[%s1622_s1 + $0x28] sm:$0xff]  }
   0x5   :  { %v1342_v14 = vsub.s32 %v164_v10, %v1333_v11  ;;  %v24_v17 = vld [vmem:[%s1623_s0] sm:$0xff]  ;;  %v1186_v21 = vld [vmem:[%s1622_s1 + $0x70] sm:$0xff]   ;;  %v1188_v29 = vld [vmem:[%s1622_s1 + $0x78] sm:$0xff]  }
   0x6   :  { %v161_v20 = vcombine.high %v24_v17, %v24_v17  ;;  %v1192_v23 = vld [vmem:[%s1622_s1 + $0x140] sm:$0xff]   ;;  %v1187_v26 = vld [vmem:[%s1622_s1 + $0x30] sm:$0xff]   ;;  %v1196_v30 = vld [vmem:[%s1622_s1 + $0x148] sm:$0xff]  }
   0x7   :  { %1087 = vmatpush3.bf16.msra.mxu1 %v1177_v3  ;;  %v168_v19 = vrot.slane %v24_v17, %v1342_v14  ;;  %v1193_v25 = vld [vmem:[%s1622_s1 + $0x100] sm:$0xff]   ;;  %1128 = vmatprep.subr.bf16.mxu0 %v1192_v23  ;;  %v1197_v32 = vld [vmem:[%s1622_s1 + $0x108] sm:$0xff]   ;;  %v1189_v33 = vld [vmem:[%s1622_s1 + $0x38] sm:$0xff]  }
   0x8   :  { %1088 = vmatprep.subr.bf16.mxu1 %v1178_v4  ;;  %v1364_v24 = vrot.slane %v161_v20, %v1342_v14  ;;  %1129 = vmatpush3.bf16.msra.mxu0 %v1193_v25  ;;  %v1190_v34 = vld [vmem:[%s1622_s1 + $0xc0] sm:$0xff]   ;;  %v1200_v35 = vld [vmem:[%s1622_s1 + $0x150] sm:$0xff]   ;;  %v1194_v39 = vld [vmem:[%s1622_s1 + $0xc8] sm:$0xff]  }
   0x9   :  { %v176_v22 = vcombine.high %v168_v19, %v168_v19  ;;  %1130 = vmatprep.subr.bf16.mxu0 %v1196_v30  ;;  %v1201_v36 = vld [vmem:[%s1622_s1 + $0x110] sm:$0xff]   ;;  %v1191_v37 = vld [vmem:[%s1622_s1 + $0x80] sm:$0xff]   ;;  %v1404_v38 = vrot.slane %v168_v19, %v1342_v14  ;;  %v1204_v41 = vld [vmem:[%s1622_s1 + $0x158] sm:$0xff]  }
   0xa   :  { %v177_v28 = vcombine.high %v1364_v24, %v1364_v24  ;;  %v1205_v42 = vld [vmem:[%s1622_s1 + $0x118] sm:$0xff]   ;;  %v1195_v43 = vld [vmem:[%s1622_s1 + $0x88] sm:$0xff]   ;;  %v1198_v44 = vld [vmem:[%s1622_s1 + $0xd0] sm:$0xff]   ;;  %v191_v59 = vrot.slane %v1364_v24, %v1342_v14 }
   0xb   :  { %1089 = vmatpush3.bf16.msra.mxu1 %v1179_v8  ;;  %v198_v27 = vrot.slane %v176_v22, %v1342_v14  ;;  %v1208_v45 = vld [vmem:[%s1622_s1 + $0x160] sm:$0xff]   ;;  %v1199_v47 = vld [vmem:[%s1622_s1 + $0x90] sm:$0xff]   ;;  %v1202_v48 = vld [vmem:[%s1622_s1 + $0xd8] sm:$0xff]   ;;  %v206_v2 = vcombine.high %v1404_v38, %v1404_v38 }
   0xc   :  { %1090 = vmatprep.subr.bf16.mxu1 %v1180_v9  ;;  %v1382_v31 = vrot.slane %v177_v28, %v1342_v14  ;;  %1131 = vmatpush3.bf16.msra.mxu0 %v1197_v32  ;;  %v1209_v46 = vld [vmem:[%s1622_s1 + $0x120] sm:$0xff]   ;;  %v1212_v49 = vld [vmem:[%s1622_s1 + $0x168] sm:$0xff]   ;;  %v1203_v51 = vld [vmem:[%s1622_s1 + $0x98] sm:$0xff]   ;;  %v207_v20 = vcombine.high %v191_v59, %v191_v59 }
   0xd   :  { %634 = vmatprep.mubr.bf16.mxu1 %v198_v27  ;;  %1132 = vmatprep.subr.bf16.mxu0 %v1200_v35  ;;  %v208_v40 = vcombine.high %v198_v27, %v198_v27  ;;  %v1213_v50 = vld [vmem:[%s1622_s1 + $0x128] sm:$0xff]   ;;  %v1206_v52 = vld [vmem:[%s1622_s1 + $0xe0] sm:$0xff]   ;;  %v1216_v53 = vld [vmem:[%s1622_s1 + $0x170] sm:$0xff]  }
   0xe   :  { %714 = vmatprep.mubr.bf16.mxu0 %v1382_v31  ;;  %v1217_v54 = vld [vmem:[%s1622_s1 + $0x130] sm:$0xff]   ;;  %v1207_v55 = vld [vmem:[%s1622_s1 + $0xa0] sm:$0xff]   ;;  %v1210_v56 = vld [vmem:[%s1622_s1 + $0xe8] sm:$0xff]   ;;  %v209_v3 = vcombine.high %v1382_v31, %v1382_v31 }
   0xf   :  { %1091 = vmatpush3.bf16.msra.mxu1 %v1181_v12  ;;  %v1220_v57 = vld [vmem:[%s1622_s1 + $0x178] sm:$0xff]   ;;  %v1211_v60 = vld [vmem:[%s1622_s1 + $0xa8] sm:$0xff]   ;;  %v1214_v61 = vld [vmem:[%s1622_s1 + $0xf0] sm:$0xff]  }
  0x10   :  { %1092 = vmatprep.subr.bf16.mxu1 %v1182_v13  ;;  %1133 = vmatpush3.bf16.msra.mxu0 %v1201_v36  ;;  %v1221_v58 = vld [vmem:[%s1622_s1 + $0x138] sm:$0xff]   ;;  %v1215_v62 = vld [vmem:[%s1622_s1 + $0xb0] sm:$0xff]   ;;  %v1222_v1 = vld [vmem:[%s1622_s1 + $0x1c0] sm:$0xff]  }
  0x11   :  { %1134 = vmatprep.subr.bf16.mxu0 %v1204_v41  ;;  %v1218_v63 = vld [vmem:[%s1622_s1 + $0xf8] sm:$0xff]   ;;  %v1224_v4 = vld [vmem:[%s1622_s1 + $0x180] sm:$0xff]   ;;  %v1225_v5 = vld [vmem:[%s1622_s1 + $0x1c8] sm:$0xff]  }
  0x12   :  { %v1219_v0 = vld [vmem:[%s1622_s1 + $0xb8] sm:$0xff]   ;;  %v1226_v6 = vld [vmem:[%s1622_s1 + $0x188] sm:$0xff]   ;;  %v1227_v7 = vld [vmem:[%s1622_s1 + $0x1d0] sm:$0xff]  }
  0x13   :  { %1093 = vmatpush3.bf16.msra.mxu1 %v1183_v15  ;;  %v1228_v8 = vld [vmem:[%s1622_s1 + $0x190] sm:$0xff]   ;;  %v1229_v9 = vld [vmem:[%s1622_s1 + $0x1d8] sm:$0xff]   ;;  %v1231_v12 = vld [vmem:[%s1622_s1 + $0x1e0] sm:$0xff]  }
  0x14   :  { %1094 = vmatprep.subr.bf16.mxu1 %v1184_v16  ;;  %1135 = vmatpush3.bf16.msra.mxu0 %v1205_v42  ;;  %v1230_v10 = vld [vmem:[%s1622_s1 + $0x198] sm:$0xff]   ;;  %v1232_v13 = vld [vmem:[%s1622_s1 + $0x1a0] sm:$0xff]   ;;  %v1233_v14 = vld [vmem:[%s1622_s1 + $0x1e8] sm:$0xff]  }
  0x15   :  { %1136 = vmatprep.subr.bf16.mxu0 %v1208_v45  ;;  %v1234_v15 = vld [vmem:[%s1622_s1 + $0x1a8] sm:$0xff]   ;;  %v1235_v16 = vld [vmem:[%s1622_s1 + $0x1f0] sm:$0xff]   ;;  %v1238_v19 = vld [vmem:[%s1622_s1 + $0x1b8] sm:$0xff]  }
  0x16   :  { %v1236_v17 = vld [vmem:[%s1622_s1 + $0x1b0] sm:$0xff]   ;;  %v1241_v22 = vld [vmem:[%s1624_s4 + $0x4] ss:$8 sps:$4 sm:$0xff]   ;;  %v1251_v30 = vld [vmem:[%s1624_s4 + $0x40] ss:$8 sps:$4 sm:$0xff]  }
  0x17   :  { %1095 = vmatpush3.bf16.msra.mxu1 %v1185_v18  ;;  %v1237_v18 = vld [vmem:[%s1622_s1 + $0x1f8] sm:$0xff]   ;;  %v1247_v25 = vld [vmem:[%s1624_s4 + $0x24] ss:$8 sps:$4 sm:$0xff]   ;;  %v1269_v42 = vld [vmem:[%s1624_s4 + $0xa0] ss:$8 sps:$4 sm:$0xff]  }
  0x18   :  { %1096 = vmatprep.subr.bf16.mxu1 %v1186_v21  ;;  %1137 = vmatpush3.bf16.msra.mxu0 %v1209_v46  ;;  %v1239_v21 = vld [vmem:[%s1624_s4] ss:$8 sps:$4 sm:$0xff]   ;;  %v1244_v23 = vld [vmem:[%s1624_s4 + $0x14] ss:$8 sps:$4 sm:$0xff]   ;;  %v1242_v24 = vld [vmem:[%s1624_s4 + $0x10] ss:$8 sps:$4 sm:$0xff]  }
  0x19   :  { %1138 = vmatprep.subr.bf16.mxu0 %v1212_v49  ;;  %v1250_v27 = vld [vmem:[%s1624_s4 + $0x34] ss:$8 sps:$4 sm:$0xff]   ;;  %v1248_v28 = vld [vmem:[%s1624_s4 + $0x30] ss:$8 sps:$4 sm:$0xff]   ;;  %v1271_v41 = vld [vmem:[%s1624_s4 + $0xa4] ss:$8 sps:$4 sm:$0xff]  }
  0x1a   :  { %v1256_v31 = vld [vmem:[%s1624_s4 + $0x54] ss:$8 sps:$4 sm:$0xff]   ;;  %v1254_v32 = vld [vmem:[%s1624_s4 + $0x50] ss:$8 sps:$4 sm:$0xff]  }
  0x1b   :  { %1097 = vmatpush3.bf16.msra.mxu1 %v1187_v26  ;;  %v1245_v26 = vld [vmem:[%s1624_s4 + $0x20] ss:$8 sps:$4 sm:$0xff]   ;;  %v1262_v35 = vld [vmem:[%s1624_s4 + $0x74] ss:$8 sps:$4 sm:$0xff]   ;;  %v1260_v36 = vld [vmem:[%s1624_s4 + $0x70] ss:$8 sps:$4 sm:$0xff]  }
  0x1c   :  { %1098 = vmatprep.subr.bf16.mxu1 %v1188_v29  ;;  %1139 = vmatpush3.bf16.msra.mxu0 %v1213_v50  ;;  %v1253_v29 = vld [vmem:[%s1624_s4 + $0x44] ss:$8 sps:$4 sm:$0xff]  }
  0x1d   :  { %1140 = vmatprep.subr.bf16.mxu0 %v1216_v53  ;;  %v992_v53 = vld [vmem:[%s1625_s2] ss:$0 sm:$0xff] }
  0x1f   :  { %1099 = vmatpush3.bf16.msra.mxu1 %v1189_v33  ;;  %v1259_v33 = vld [vmem:[%s1624_s4 + $0x64] ss:$8 sps:$4 sm:$0xff]  }
  0x20   :  { %1106 = vmatprep.subr.bf16.mxu1 %v1190_v34  ;;  %1141 = vmatpush3.bf16.msra.mxu0 %v1217_v54  ;;  %v1257_v34 = vld [vmem:[%s1624_s4 + $0x60] ss:$8 sps:$4 sm:$0xff]  }
  0x21   :  { %1142 = vmatprep.subr.bf16.mxu0 %v1220_v57 }
  0x22   :  { %635 = vmatmul.mubr.bf16.vlgmr.msra.gmra.mrb[0].mxu1 %v1404_v38  ;;  %v1263_v38 = vld [vmem:[%s1624_s4 + $0x80] ss:$8 sps:$4 sm:$0xff]  }
  0x23   :  { %1107 = vmatpush3.bf16.msra.mxu1 %v1191_v37  ;;  %674 = vmatprep.mubr.bf16.mxu1 %v208_v40  ;;  %v1265_v37 = vld [vmem:[%s1624_s4 + $0x84] ss:$8 sps:$4 sm:$0xff]   ;;  %v1266_v40 = vld [vmem:[%s1624_s4 + $0x90] ss:$8 sps:$4 sm:$0xff]  }
  0x24   :  { %1108 = vmatprep.subr.bf16.mxu1 %v1194_v39  ;;  %1143 = vmatpush3.bf16.msra.mxu0 %v1221_v58  ;;  %v1268_v39 = vld [vmem:[%s1624_s4 + $0x94] ss:$8 sps:$4 sm:$0xff]  }
  0x25   :  { %935 = vmatprep.subr.bf16.mxu0 %v1241_v22 }
  0x27   :  { %1109 = vmatpush3.bf16.msra.mxu1 %v1195_v43  ;;  %715 = vmatmul.mubr.bf16.vlgmr.msra.gmra.mrb[0].mxu0 %v191_v59 }
  0x28   :  { %1110 = vmatprep.subr.bf16.mxu1 %v1198_v44  ;;  %936 = vmatpush1.bf16.msra.mxu0 %v1239_v21 }
  0x29   :  { %937 = vmatprep.subr.bf16.mxu0 %v1244_v23 }
  0x2b   :  { %1111 = vmatpush3.bf16.msra.mxu1 %v1199_v47 }
  0x2c   :  { %1112 = vmatprep.subr.bf16.mxu1 %v1202_v48  ;;  %938 = vmatpush1.bf16.msra.mxu0 %v1242_v24 }
  0x2d   :  { %939 = vmatprep.subr.bf16.mxu0 %v1247_v25 }
  0x2f   :  { %1113 = vmatpush3.bf16.msra.mxu1 %v1203_v51 }
  0x30   :  { %1114 = vmatprep.subr.bf16.mxu1 %v1206_v52  ;;  %940 = vmatpush1.bf16.msra.mxu0 %v1245_v26 }
  0x31   :  { %941 = vmatprep.subr.bf16.mxu0 %v1250_v27 }
  0x33   :  { %1115 = vmatpush3.bf16.msra.mxu1 %v1207_v55 }
  0x34   :  { %1116 = vmatprep.subr.bf16.mxu1 %v1210_v56  ;;  %942 = vmatpush1.bf16.msra.mxu0 %v1248_v28 }
  0x35   :  { %943 = vmatprep.subr.bf16.mxu0 %v1253_v29 }
  0x37   :  { %1117 = vmatpush3.bf16.msra.mxu1 %v1211_v60 }
  0x38   :  { %1118 = vmatprep.subr.bf16.mxu1 %v1214_v61  ;;  %944 = vmatpush1.bf16.msra.mxu0 %v1251_v30 }
  0x39   :  { %945 = vmatprep.subr.bf16.mxu0 %v1256_v31 }
  0x3b   :  { %1119 = vmatpush3.bf16.msra.mxu1 %v1215_v62  ;;  %v1274_v62 = vld [vmem:[%s1624_s4 + $0xb4] ss:$8 sps:$4 sm:$0xff]  }
  0x3c   :  { %1120 = vmatprep.subr.bf16.mxu1 %v1218_v63  ;;  %946 = vmatpush1.bf16.msra.mxu0 %v1254_v32  ;;  %v1272_v63 = vld [vmem:[%s1624_s4 + $0xb0] ss:$8 sps:$4 sm:$0xff]   ;;  %s1276_s4 = smov 64  }
  0x3d   :  { %947 = vmatprep.subr.bf16.mxu0 %v1259_v33 }
  0x3f   :  { %1121 = vmatpush3.bf16.msra.mxu1 %v1219_v0 }
  0x40   :  { %1150 = vmatprep.subr.bf16.mxu1 %v1222_v1  ;;  %948 = vmatpush1.bf16.msra.mxu0 %v1257_v34 }
  0x41   :  { %949 = vmatprep.subr.bf16.mxu0 %v1262_v35 }
  0x42   :  { %675 = vmatmul.mubr.bf16.vlgmr.msra.gmra.mrb[4].mxu1 %v206_v2 }
  0x43   :  { %1151 = vmatpush3.bf16.msra.mxu1 %v1224_v4  ;;  %754 = vmatprep.mubr.bf16.mxu1 %v209_v3 }
  0x44   :  { %1152 = vmatprep.subr.bf16.mxu1 %v1225_v5  ;;  %950 = vmatpush1.bf16.msra.mxu0 %v1260_v36 }
  0x45   :  { %951 = vmatprep.subr.bf16.mxu0 %v1265_v37 }
  0x47   :  { %1153 = vmatpush3.bf16.msra.mxu1 %v1226_v6  ;;  %v763_v6 = vld [vmem:[%s1626_s3] sm:$0x3] }
  0x48   :  { %1154 = vmatprep.subr.bf16.mxu1 %v1227_v7  ;;  %952 = vmatpush1.bf16.msra.mxu0 %v1263_v38  ;;  %v1057_v7 = vld [vmem:[%s1626_s3 + $0x2] sm:$0x3] }
  0x49   :  { %953 = vmatprep.subr.bf16.mxu0 %v1268_v39 }
  0x4b   :  { %1155 = vmatpush3.bf16.msra.mxu1 %v1228_v8 }
  0x4c   :  { %1156 = vmatprep.subr.bf16.mxu1 %v1229_v9  ;;  %954 = vmatpush1.bf16.msra.mxu0 %v1266_v40 }
  0x4d   :  { %955 = vmatprep.subr.bf16.mxu0 %v1271_v41 }
  0x4f   :  { %1157 = vmatpush3.bf16.msra.mxu1 %v1230_v10 }
  0x50   :  { %1158 = vmatprep.subr.bf16.mxu1 %v1231_v12  ;;  %956 = vmatpush1.bf16.msra.mxu0 %v1269_v42 }
  0x51   :  { %957 = vmatprep.subr.bf16.mxu0 %v1274_v62 }
  0x53   :  { %1159 = vmatpush3.bf16.msra.mxu1 %v1232_v13 }
  0x54   :  { %1160 = vmatprep.subr.bf16.mxu1 %v1233_v14  ;;  %958 = vmatpush1.bf16.msra.mxu0 %v1272_v63 }
  0x57   :  { %1161 = vmatpush3.bf16.msra.mxu1 %v1234_v15 }
  0x58   :  { %1162 = vmatprep.subr.bf16.mxu1 %v1235_v16  ;;  %v804_v16 = vsub.s32 0, %v1333_v11 }
  0x5b   :  { %1163 = vmatpush3.bf16.msra.mxu1 %v1236_v17  ;;  %v800_v17 = vld [vmem:[%s1627_s5] sm:$0x3] }
  0x5c   :  { %1164 = vmatprep.subr.bf16.mxu1 %v1237_v18  ;;  %v808_v18 = vsub.s32 1, %v1333_v11 }
  0x5f   :  { %1165 = vmatpush3.bf16.msra.mxu1 %v1238_v19  ;;  %v805_v19 = vrot.slane %v800_v17, %v804_v16 }
  0x62   :  { %755 = vmatmul.mubr.bf16.vlgmr.msra.gmra.mrb[8].mxu1 %v207_v20  ;;  %v809_v20 = vrot.slane %v800_v17, %v808_v18 }
  0xf5   :  { %v1100_v43 = vpop.f32.mrb[0].mxu1 }
  0xf6   :  { %v1101_v44 = vpop.f32.mrb[1].mxu1 }
  0xf7   :  { %v1102_v45 = vadd.f32 %v1101_v44, %v1100_v43  ;;  %v1103_v46 = vpop.f32.mrb[2].mxu1 }
  0xf8   :  { %v1104_v47 = vpop.f32.mrb[3].mxu1 }
  0xf9   :  { %v637_v56 = vadd.f32 %v1102_v45, %v992_v53 }
  0xfa   :  { %v1144_v48 = vpop.f32.mrb[0].mxu0 }
  0xfb   :  { %v1145_v49 = vpop.f32.mrb[1].mxu0 }
  0xfc   :  { %v1146_v50 = vadd.f32 %v1145_v49, %v1144_v48  ;;  %v1147_v51 = vpop.f32.mrb[2].mxu0 }
  0xfd   :  { %v1148_v52 = vpop.f32.mrb[3].mxu0 }
 0x115   :  { %v1122_v54 = vpop.f32.mrb[4].mxu1 }
 0x116   :  { %v1123_v55 = vpop.f32.mrb[5].mxu1 }
 0x117   :  { %v1124_v57 = vadd.f32 %v1123_v55, %v1122_v54  ;;  %v1125_v58 = vpop.f32.mrb[6].mxu1 }
 0x118   :  { %v1126_v59 = vpop.f32.mrb[7].mxu1 }
 0x119   :  { %v677_v60 = vadd.f32 %v1124_v57, %v637_v56 }
 0x11b   :  { %v717_v61 = vadd.f32 %v1146_v50, %v677_v60 }
 0x135   :  { %v1166_v0 = vpop.f32.mrb[8].mxu1 }
 0x136   :  { %v1167_v1 = vpop.f32.mrb[9].mxu1 }
 0x137   :  { %v1168_v2 = vadd.f32 %v1167_v1, %v1166_v0  ;;  %v1169_v3 = vpop.f32.mrb[10].mxu1 }
 0x138   :  { %v1170_v4 = vpop.f32.mrb[11].mxu1 }
 0x139   :  { %v757_v5 = vadd.f32 %v1168_v2, %v717_v61 }
 0x13b   :  { %v762_v8 = vmax.f32 %v757_v5, 0.0 }
 0x13d   :  { %v764_v9 = vmul.f32 %v763_v6, %v762_v8  ;;  %v767_v10 = vmul.f32 %v1057_v7, %v762_v8 }
 0x13f   :  { %769 = vrot.lane.b32.xlu0 %v764_v9, %s1276_s4  ;;  %v775_v12 = vpack.c.bf16 %v767_v10, %v767_v10 }
 0x141   :  { %1082 = vmatprep.mubr.msk.bf16.mxu0 %vm772_vm0, %v775_v12 }
 0x1b1   :  { %v770_v13 = vpop.permute.xlu0 %769 }
 0x1b2   :  { %v773_v14 = vsel %vm772_vm0, %v762_v8, %v770_v13 }
 0x1b3   :  { %v774_v15 = vpack.c.bf16 %v773_v14, %v773_v14 }
 0x1b5   :  { %968 = vmatmul.mubr.bf16.vlgmr.msra.gmra.mrb[4].mxu0 %v774_v15 }
 0x288   :  { %v969_v21 = vpop.f32.mrb[4].mxu0 }
 0x289   :  { %v970_v22 = vadd.f32 %v969_v21, %v805_v19  ;;  %v971_v23 = vpop.f32.mrb[5].mxu0 }
 0x28a   :  { %v972_v24 = vadd.f32 %v971_v23, %v809_v20  ;;  %v973_v25 = vpop.f32.mrb[6].mxu0 }
 0x28b   :  { %v974_v26 = vpop.f32.mrb[7].mxu0 }
 0x28c   :  { %v978_v27 = vcombine.low %v970_v22, %v972_v24 }
 0x28e   :  { %1083 = vst.sshfl [vmem:[%s1628_s6] sm:$0x33 pattern:$0x76325410] %v978_v27 }

</bundles_post_ra>
